<compile_context>
chip_gen: v7x
topology: tpu7x:2x2x1
jax: 0.10.0
libtpu: 0.0.40
codegen_flags: <defaults>
</compile_context>

<pallas_src>
import functools

import jax
import jax.numpy as jnp
from jax.experimental import pallas as pl
from jax.experimental.pallas import tpu as pltpu


def _round_up(x, m):
    return (x + m - 1) // m * m


def _stemconv_kernel(x_ref, xh_ref, w1_ref, b1_ref, w2_ref, b2_ref, o_ref,
                     col_ref, *, add_b1, mish_dtype):
    # x_ref  : (1, C_in_p, T)      current L tile of the host-padded input
    # xh_ref : (1, C_in_p, 128)    right halo (next 128 padded columns)
    # w1_ref : (C_mid, K*C_in_p)   BN-folded im2col conv1 weights (+bias col)
    # b1_ref : (C_mid, 1)          conv1 bias (f32) -- only read if add_b1
    # w2_ref : (F, C_mid), b2_ref: (F, 1)   1x1 conv
    # o_ref  : (1, F, T)
    # col_ref: (K*C_in_p, T)       im2col scratch (compute dtype)
    C_in_p = x_ref.shape[1]
    T = x_ref.shape[2]
    K = col_ref.shape[0] // C_in_p

    # im2col straight from the tile + halo (no staging copy):
    #   col[k*C_in_p + c, t] = x_padded[c, l*T + t + k]
    for k in range(K):
        r = k * C_in_p
        if k == 0:
            col_ref[r:r + C_in_p, :] = x_ref[0]
        else:
            col_ref[r:r + C_in_p, :T - k] = x_ref[0, :, k:]
            col_ref[r:r + C_in_p, T - k:] = xh_ref[0, :, :k]

    # conv1 (+ folded BatchNorm, + bias via the ones-channel) as ONE matmul,
    # f32 accumulation on the MXU.
    h = jnp.dot(w1_ref[...], col_ref[...], preferred_element_type=jnp.float32)
    if add_b1:                      # only when the bias could not be folded
        h = h + b1_ref[...]

    # Mish: h * tanh(softplus(h)) = h * ((1+e^h)^2 - 1) / ((1+e^h)^2 + 1)
    # (single EUP exp; exact divide; clamp -- ratio is exactly 1.0 for h>=20)
    a = h.astype(mish_dtype)
    t = jnp.exp(jnp.minimum(a, 20.0))
    u = (1.0 + t) * (1.0 + t)
    act = a * ((u - 1.0) / (u + 1.0))

    # 1x1 conv: pointwise channel matmul, f32 accumulation.
    out = jnp.dot(w2_ref[...], act.astype(w2_ref.dtype),
                  preferred_element_type=jnp.float32) + b2_ref[...]
    o_ref[0] = out.astype(o_ref.dtype)


def stemconv(x, params, *, l_tile=4096, compute_dtype=jnp.bfloat16,
             mish_dtype=jnp.float32, out_dtype=None, interpret=False):
    """StemConv forward. x: (B, C_in, L) -> (B, filters, L).

    params: PyTorch-layout tuple
      (w1 (C_mid,C_in,K), b1 (C_mid,), gamma, beta, mean, var (C_mid,),
       w2 (F,C_mid,1), b2 (F,))

    Tuning (per generation):
      * compute_dtype=jnp.bfloat16 (default): bf16 MXU + halved input/im2col
        traffic, f32 accumulation.  Use jnp.float32 for bit-accuracy.
      * out_dtype=jnp.bfloat16 on v5e/v6e: halves the dominant HBM stream.
      * mish_dtype=jnp.bfloat16 on v6e/v7x (bf16 VPU/EUP); keep f32 on v5e.
      * l_tile: 4096 default is VMEM-safe on v7x; 16384-32768 on v5e/v6e.
    """
    w1, b1, gamma, beta, mean, var, w2, b2 = params
    out_dtype = jnp.dtype(x.dtype if out_dtype is None else out_dtype)
    compute_dtype = jnp.dtype(compute_dtype)
    mish_dtype = jnp.dtype(mish_dtype)

    B, C_in, L = x.shape
    C_mid, _, K = w1.shape
    F = w2.shape[0]
    P = (K - 1) // 2
    HALO_W = 128
    assert K - 1 <= HALO_W, "halo block assumes kernel_size - 1 <= 128"

    # Pad C_in to a full sublane pack of the compute dtype (8 f32 / 16 bf16).
    pack = 8 * (4 // compute_dtype.itemsize)
    C_in_p = _round_up(C_in, pack)
    # If there is a spare padded channel, carry the conv1 bias on it ("ones"
    # channel) so no broadcast bias add is needed in the kernel (exact fold).
    fold_b1 = C_in < C_in_p

    # ---- host-side BatchNorm folding into conv1 (eval mode, eps=1e-5) ----
    s = (gamma * jax.lax.rsqrt(var + 1e-5)).astype(jnp.float32)         # (C_mid,)
    bias1 = ((b1 - mean) * s + beta).astype(jnp.float32)                # (C_mid,)

    # ---- im2col weight layout: w1f[co, k*C_in_p + c] = w1[co, c, k] * s ----
    w1p = jnp.pad(w1.astype(jnp.float32), ((0, 0), (0, C_in_p - C_in), (0, 0)))
    w1f = (jnp.transpose(w1p, (0, 2, 1)).reshape(C_mid, K * C_in_p)
           * s[:, None])
    if fold_b1:
        # center tap of the first spare channel carries the bias
        w1f = w1f.at[:, P * C_in_p + C_in].set(bias1)
    b1m = bias1.reshape(C_mid, 1)
    w2m = w2.reshape(F, C_mid).astype(jnp.float32)
    b2m = b2.reshape(F, 1).astype(jnp.float32)
    # TODO(synk): the (F, T) bias add for b2 is not folded into the matmul.

    # ---- L tiling (lane-dense multiples of 128), minimal right halo pad ----
    T = max(HALO_W, min(_round_up(L, HALO_W), _round_up(l_tile, HALO_W)))
    n_l = pl.cdiv(L, T)
    Lp = n_l * T + HALO_W                       # only 128 zero cols past last tile
    xp = jnp.pad(x, ((0, 0), (0, C_in_p - C_in), (P, Lp - L - P)))
    if fold_b1:
        xp = xp.at[:, C_in, P:P + L].set(1.0)   # ones channel over valid data

    xp = xp.astype(compute_dtype)
    w1f = w1f.astype(compute_dtype)
    w2m = w2m.astype(compute_dtype)

    lt = T // HALO_W

    # VMEM budget estimate (double-buffered I/O + scratch + f32 temporaries),
    # kept well under v7x's 64 MiB per-TC VMEM at the defaults.
    bc, bo = compute_dtype.itemsize, out_dtype.itemsize
    est = (2 * C_in_p * (T + HALO_W) * bc            # x tile + halo (x2 buffers)
           + K * C_in_p * T * bc                     # im2col scratch
           + 2 * F * T * bo                          # output tile (x2 buffers)
           + 8 * (C_mid * K * C_in_p + C_mid + F * C_mid + F)   # weights/bias
           + 4 * C_mid * T * 4)                      # f32 h + Mish temporaries
    vmem_limit = int(min(1.5 * est + (8 << 20), 100 << 20))

    kernel = functools.partial(_stemconv_kernel, add_b1=not fold_b1,
                               mish_dtype=mish_dtype)

    out = pl.pallas_call(
        kernel,
        out_shape=jax.ShapeDtypeStruct((B, F, n_l * T), out_dtype),
        grid_spec=pltpu.PrefetchScalarGridSpec(
            num_scalar_prefetch=0,
            grid=(B, n_l),
            in_specs=[
                pl.BlockSpec((1, C_in_p, T), lambda b, l: (b, 0, l)),          # x tile
                pl.BlockSpec((1, C_in_p, HALO_W),
                             lambda b, l: (b, 0, (l + 1) * lt)),               # right halo
                pl.BlockSpec((C_mid, K * C_in_p), lambda b, l: (0, 0)),        # w1 (BN+bias folded)
                pl.BlockSpec((C_mid, 1), lambda b, l: (0, 0)),                 # b1 (fallback only)
                pl.BlockSpec((F, C_mid), lambda b, l: (0, 0)),                 # w2 (1x1 conv)
                pl.BlockSpec((F, 1), lambda b, l: (0, 0)),                     # b2
            ],
            out_specs=pl.BlockSpec((1, F, T), lambda b, l: (b, 0, l)),
            scratch_shapes=[
                pltpu.VMEM((K * C_in_p, T), compute_dtype),                    # im2col
            ],
        ),
        compiler_params=pltpu.CompilerParams(
            dimension_semantics=("parallel", "parallel"),
            vmem_limit_bytes=vmem_limit),
        interpret=interpret,
    )(xp, xp, w1f, b1m, w2m, b2m)

    return out[:, :, :L]


def stemconv_ref(x, params):
    """Pure-JAX reference (eval-mode BatchNorm), for a sanity check."""
    w1, b1, gamma, beta, mean, var, w2, b2 = params
    y = jax.lax.conv_general_dilated(
        x, w1, window_strides=(1,), padding='SAME',
        dimension_numbers=('NCH', 'OIH', 'NCH'))
    y = y + b1[None, :, None]
    y = ((y - mean[None, :, None]) * jax.lax.rsqrt(var[None, :, None] + 1e-5)
         * gamma[None, :, None] + beta[None, :, None])
    y = y * jnp.tanh(jax.nn.softplus(y))
    y = jnp.einsum('fc,bcl->bfl', w2.reshape(w2.shape[0], -1), y)
    return y + b2[None, :, None]


def make_params(key, c_in, filters=8, filter_firstlayer_factor=1.5,
                kernel_size=11):
    """Deterministic PyTorch-layout parameters."""
    c_mid = int(filters * filter_firstlayer_factor)
    ks = jax.random.split(key, 8)
    w1 = 0.1 * jax.random.normal(ks[0], (c_mid, c_in, kernel_size), jnp.float32)
    b1 = 0.1 * jax.random.normal(ks[1], (c_mid,), jnp.float32)
    gamma = 1.0 + 0.1 * jax.random.normal(ks[2], (c_mid,), jnp.float32)
    beta = 0.1 * jax.random.normal(ks[3], (c_mid,), jnp.float32)
    mean = 0.1 * jax.random.normal(ks[4], (c_mid,), jnp.float32)
    var = jnp.abs(1.0 + 0.1 * jax.random.normal(ks[5], (c_mid,), jnp.float32))
    w2 = 0.1 * jax.random.normal(ks[6], (filters, c_mid, 1), jnp.float32)
    b2 = 0.1 * jax.random.normal(ks[7], (filters,), jnp.float32)
    return (w1, b1, gamma, beta, mean, var, w2, b2)


if __name__ == "__main__":
    key = jax.random.PRNGKey(0)
    kx, kp, kx2, kp2 = jax.random.split(key, 4)

    B, L, filters = 2, 16, 8

    # --- Test 1: default bf16-compute path (bias folded via ones-channel) ---
    C_in = 4
    x = jax.random.normal(kx, (B, C_in, L), jnp.float32)
    params = make_params(kp, C_in, filters=filters)
    out = stemconv(x, params)                      # bf16 MXU, f32 out
    jax.block_until_ready(out)
    assert out.shape == (B, filters, L)
    assert bool(jnp.all(jnp.isfinite(out)))
    ref = stemconv_ref(x, params)
    err = float(jnp.max(jnp.abs(out - ref)))
    assert err < 2e-2, "bf16 path max abs err = %g" % err

    # --- Test 2: f32-compute path with sublane-aligned C_in (explicit bias) ---
    C_in2 = 8
    x2 = jax.random.normal(kx2, (B, C_in2, L), jnp.float32)
    params2 = make_params(kp2, C_in2, filters=filters)
    out2 = stemconv(x2, params2, compute_dtype=jnp.float32)
    jax.block_until_ready(out2)
    ref2 = stemconv_ref(x2, params2)
    err2 = float(jnp.max(jnp.abs(out2 - ref2)))
    assert err2 < 1e-3, "f32 path max abs err = %g" % err2

    print("KERNEL_OK")
</pallas_src>

<mosaic_0001>
module attributes {stable_mosaic.version = 11 : i64} {
  func.func @_stemconv_kernel(%arg0: i32, %arg1: i32, %arg2: memref<1x16x128xbf16, #tpu.memory_space<vmem>>, %arg3: memref<1x16x128xbf16, #tpu.memory_space<vmem>>, %arg4: memref<12x176xbf16, #tpu.memory_space<vmem>>, %arg5: memref<12x1xf32, #tpu.memory_space<vmem>>, %arg6: memref<8x12xbf16, #tpu.memory_space<vmem>>, %arg7: memref<8x1xf32, #tpu.memory_space<vmem>>, %arg8: memref<1x8x128xf32, #tpu.memory_space<vmem>>, %arg9: memref<176x128xbf16, #tpu.memory_space<vmem>>) attributes {dimension_semantics = [#tpu.dimension_semantics<parallel>, #tpu.dimension_semantics<parallel>], iteration_bounds = array<i64: 2, 1>, scalar_prefetch = 0 : i64, scratch_operands = 1 : i64, tpu.core_type = #tpu.core_type<tc>, window_params = [{transform_indices = @transform_0, window_bounds = array<i64: 1, 16, 128>}, {transform_indices = @transform_1, window_bounds = array<i64: 1, 16, 128>}, {pipeline_mode = #tpu.pipeline_mode<synchronous>, transform_indices = @transform_2, window_bounds = array<i64: 12, 176>}, {pipeline_mode = #tpu.pipeline_mode<synchronous>, transform_indices = @transform_3, window_bounds = array<i64: 12, 1>}, {pipeline_mode = #tpu.pipeline_mode<synchronous>, transform_indices = @transform_4, window_bounds = array<i64: 8, 12>}, {pipeline_mode = #tpu.pipeline_mode<synchronous>, transform_indices = @transform_5, window_bounds = array<i64: 8, 1>}, {transform_indices = @transform_6, window_bounds = array<i64: 1, 8, 128>}]} {
    %c0 = arith.constant 0 : index
    %c0_0 = arith.constant 0 : index
    %c0_1 = arith.constant 0 : index
    %0 = vector.load %arg2[%c0, %c0_0, %c0_1] : memref<1x16x128xbf16, #tpu.memory_space<vmem>>, vector<1x16x128xbf16>
    %1 = vector.shape_cast %0 : vector<1x16x128xbf16> to vector<16x128xbf16>
    %c0_2 = arith.constant 0 : index
    %c0_3 = arith.constant 0 : index
    %2 = vector.load %arg9[%c0_2, %c0_3] : memref<176x128xbf16, #tpu.memory_space<vmem>>, vector<16x128xbf16>
    tpu.vector_store %arg9[%c0_2, %c0_3], %1 {strides = array<i32>} : memref<176x128xbf16, #tpu.memory_space<vmem>>, vector<16x128xbf16>,
    %c0_4 = arith.constant 0 : index
    %c0_5 = arith.constant 0 : index
    %c1 = arith.constant 1 : index
    %3 = vector.load %arg2[%c0_4, %c0_5, %c1] : memref<1x16x128xbf16, #tpu.memory_space<vmem>>, vector<1x16x127xbf16>
    %4 = vector.shape_cast %3 : vector<1x16x127xbf16> to vector<16x127xbf16>
    %c16 = arith.constant 16 : index
    %c0_6 = arith.constant 0 : index
    %5 = vector.load %arg9[%c16, %c0_6] : memref<176x128xbf16, #tpu.memory_space<vmem>>, vector<16x127xbf16>
    tpu.vector_store %arg9[%c16, %c0_6], %4 {strides = array<i32>} : memref<176x128xbf16, #tpu.memory_space<vmem>>, vector<16x127xbf16>,
    %c0_7 = arith.constant 0 : index
    %c0_8 = arith.constant 0 : index
    %c0_9 = arith.constant 0 : index
    %6 = vector.load %arg3[%c0_7, %c0_8, %c0_9] : memref<1x16x128xbf16, #tpu.memory_space<vmem>>, vector<1x16x1xbf16>
    %7 = vector.shape_cast %6 : vector<1x16x1xbf16> to vector<16x1xbf16>
    %c16_10 = arith.constant 16 : index
    %c127 = arith.constant 127 : index
    %8 = vector.load %arg9[%c16_10, %c127] : memref<176x128xbf16, #tpu.memory_space<vmem>>, vector<16x1xbf16>
    tpu.vector_store %arg9[%c16_10, %c127], %7 {strides = array<i32>} : memref<176x128xbf16, #tpu.memory_space<vmem>>, vector<16x1xbf16>,
    %c0_11 = arith.constant 0 : index
    %c0_12 = arith.constant 0 : index
    %c2 = arith.constant 2 : index
    %9 = vector.load %arg2[%c0_11, %c0_12, %c2] : memref<1x16x128xbf16, #tpu.memory_space<vmem>>, vector<1x16x126xbf16>
    %10 = vector.shape_cast %9 : vector<1x16x126xbf16> to vector<16x126xbf16>
    %c32 = arith.constant 32 : index
    %c0_13 = arith.constant 0 : index
    %11 = vector.load %arg9[%c32, %c0_13] : memref<176x128xbf16, #tpu.memory_space<vmem>>, vector<16x126xbf16>
    tpu.vector_store %arg9[%c32, %c0_13], %10 {strides = array<i32>} : memref<176x128xbf16, #tpu.memory_space<vmem>>, vector<16x126xbf16>,
    %c0_14 = arith.constant 0 : index
    %c0_15 = arith.constant 0 : index
    %c0_16 = arith.constant 0 : index
    %12 = vector.load %arg3[%c0_14, %c0_15, %c0_16] : memref<1x16x128xbf16, #tpu.memory_space<vmem>>, vector<1x16x2xbf16>
    %13 = vector.shape_cast %12 : vector<1x16x2xbf16> to vector<16x2xbf16>
    %c32_17 = arith.constant 32 : index
    %c126 = arith.constant 126 : index
    %14 = vector.load %arg9[%c32_17, %c126] : memref<176x128xbf16, #tpu.memory_space<vmem>>, vector<16x2xbf16>
    tpu.vector_store %arg9[%c32_17, %c126], %13 {strides = array<i32>} : memref<176x128xbf16, #tpu.memory_space<vmem>>, vector<16x2xbf16>,
    %c0_18 = arith.constant 0 : index
    %c0_19 = arith.constant 0 : index
    %c3 = arith.constant 3 : index
    %15 = vector.load %arg2[%c0_18, %c0_19, %c3] : memref<1x16x128xbf16, #tpu.memory_space<vmem>>, vector<1x16x125xbf16>
    %16 = vector.shape_cast %15 : vector<1x16x125xbf16> to vector<16x125xbf16>
    %c48 = arith.constant 48 : index
    %c0_20 = arith.constant 0 : index
    %17 = vector.load %arg9[%c48, %c0_20] : memref<176x128xbf16, #tpu.memory_space<vmem>>, vector<16x125xbf16>
    tpu.vector_store %arg9[%c48, %c0_20], %16 {strides = array<i32>} : memref<176x128xbf16, #tpu.memory_space<vmem>>, vector<16x125xbf16>,
    %c0_21 = arith.constant 0 : index
    %c0_22 = arith.constant 0 : index
    %c0_23 = arith.constant 0 : index
    %18 = vector.load %arg3[%c0_21, %c0_22, %c0_23] : memref<1x16x128xbf16, #tpu.memory_space<vmem>>, vector<1x16x3xbf16>
    %19 = vector.shape_cast %18 : vector<1x16x3xbf16> to vector<16x3xbf16>
    %c48_24 = arith.constant 48 : index
    %c125 = arith.constant 125 : index
    %20 = vector.load %arg9[%c48_24, %c125] : memref<176x128xbf16, #tpu.memory_space<vmem>>, vector<16x3xbf16>
    tpu.vector_store %arg9[%c48_24, %c125], %19 {strides = array<i32>} : memref<176x128xbf16, #tpu.memory_space<vmem>>, vector<16x3xbf16>,
    %c0_25 = arith.constant 0 : index
    %c0_26 = arith.constant 0 : index
    %c4 = arith.constant 4 : index
    %21 = vector.load %arg2[%c0_25, %c0_26, %c4] : memref<1x16x128xbf16, #tpu.memory_space<vmem>>, vector<1x16x124xbf16>
    %22 = vector.shape_cast %21 : vector<1x16x124xbf16> to vector<16x124xbf16>
    %c64 = arith.constant 64 : index
    %c0_27 = arith.constant 0 : index
    %23 = vector.load %arg9[%c64, %c0_27] : memref<176x128xbf16, #tpu.memory_space<vmem>>, vector<16x124xbf16>
    tpu.vector_store %arg9[%c64, %c0_27], %22 {strides = array<i32>} : memref<176x128xbf16, #tpu.memory_space<vmem>>, vector<16x124xbf16>,
    %c0_28 = arith.constant 0 : index
    %c0_29 = arith.constant 0 : index
    %c0_30 = arith.constant 0 : index
    %24 = vector.load %arg3[%c0_28, %c0_29, %c0_30] : memref<1x16x128xbf16, #tpu.memory_space<vmem>>, vector<1x16x4xbf16>
    %25 = vector.shape_cast %24 : vector<1x16x4xbf16> to vector<16x4xbf16>
    %c64_31 = arith.constant 64 : index
    %c124 = arith.constant 124 : index
    %26 = vector.load %arg9[%c64_31, %c124] : memref<176x128xbf16, #tpu.memory_space<vmem>>, vector<16x4xbf16>
    tpu.vector_store %arg9[%c64_31, %c124], %25 {strides = array<i32>} : memref<176x128xbf16, #tpu.memory_space<vmem>>, vector<16x4xbf16>,
    %c0_32 = arith.constant 0 : index
    %c0_33 = arith.constant 0 : index
    %c5 = arith.constant 5 : index
    %27 = vector.load %arg2[%c0_32, %c0_33, %c5] : memref<1x16x128xbf16, #tpu.memory_space<vmem>>, vector<1x16x123xbf16>
    %28 = vector.shape_cast %27 : vector<1x16x123xbf16> to vector<16x123xbf16>
    %c80 = arith.constant 80 : index
    %c0_34 = arith.constant 0 : index
    %29 = vector.load %arg9[%c80, %c0_34] : memref<176x128xbf16, #tpu.memory_space<vmem>>, vector<16x123xbf16>
    tpu.vector_store %arg9[%c80, %c0_34], %28 {strides = array<i32>} : memref<176x128xbf16, #tpu.memory_space<vmem>>, vector<16x123xbf16>,
    %c0_35 = arith.constant 0 : index
    %c0_36 = arith.constant 0 : index
    %c0_37 = arith.constant 0 : index
    %30 = vector.load %arg3[%c0_35, %c0_36, %c0_37] : memref<1x16x128xbf16, #tpu.memory_space<vmem>>, vector<1x16x5xbf16>
    %31 = vector.shape_cast %30 : vector<1x16x5xbf16> to vector<16x5xbf16>
    %c80_38 = arith.constant 80 : index
    %c123 = arith.constant 123 : index
    %32 = vector.load %arg9[%c80_38, %c123] : memref<176x128xbf16, #tpu.memory_space<vmem>>, vector<16x5xbf16>
    tpu.vector_store %arg9[%c80_38, %c123], %31 {strides = array<i32>} : memref<176x128xbf16, #tpu.memory_space<vmem>>, vector<16x5xbf16>,
    %c0_39 = arith.constant 0 : index
    %c0_40 = arith.constant 0 : index
    %c6 = arith.constant 6 : index
    %33 = vector.load %arg2[%c0_39, %c0_40, %c6] : memref<1x16x128xbf16, #tpu.memory_space<vmem>>, vector<1x16x122xbf16>
    %34 = vector.shape_cast %33 : vector<1x16x122xbf16> to vector<16x122xbf16>
    %c96 = arith.constant 96 : index
    %c0_41 = arith.constant 0 : index
    %35 = vector.load %arg9[%c96, %c0_41] : memref<176x128xbf16, #tpu.memory_space<vmem>>, vector<16x122xbf16>
    tpu.vector_store %arg9[%c96, %c0_41], %34 {strides = array<i32>} : memref<176x128xbf16, #tpu.memory_space<vmem>>, vector<16x122xbf16>,
    %c0_42 = arith.constant 0 : index
    %c0_43 = arith.constant 0 : index
    %c0_44 = arith.constant 0 : index
    %36 = vector.load %arg3[%c0_42, %c0_43, %c0_44] : memref<1x16x128xbf16, #tpu.memory_space<vmem>>, vector<1x16x6xbf16>
    %37 = vector.shape_cast %36 : vector<1x16x6xbf16> to vector<16x6xbf16>
    %c96_45 = arith.constant 96 : index
    %c122 = arith.constant 122 : index
    %38 = vector.load %arg9[%c96_45, %c122] : memref<176x128xbf16, #tpu.memory_space<vmem>>, vector<16x6xbf16>
    tpu.vector_store %arg9[%c96_45, %c122], %37 {strides = array<i32>} : memref<176x128xbf16, #tpu.memory_space<vmem>>, vector<16x6xbf16>,
    %c0_46 = arith.constant 0 : index
    %c0_47 = arith.constant 0 : index
    %c7 = arith.constant 7 : index
    %39 = vector.load %arg2[%c0_46, %c0_47, %c7] : memref<1x16x128xbf16, #tpu.memory_space<vmem>>, vector<1x16x121xbf16>
    %40 = vector.shape_cast %39 : vector<1x16x121xbf16> to vector<16x121xbf16>
    %c112 = arith.constant 112 : index
    %c0_48 = arith.constant 0 : index
    %41 = vector.load %arg9[%c112, %c0_48] : memref<176x128xbf16, #tpu.memory_space<vmem>>, vector<16x121xbf16>
    tpu.vector_store %arg9[%c112, %c0_48], %40 {strides = array<i32>} : memref<176x128xbf16, #tpu.memory_space<vmem>>, vector<16x121xbf16>,
    %c0_49 = arith.constant 0 : index
    %c0_50 = arith.constant 0 : index
    %c0_51 = arith.constant 0 : index
    %42 = vector.load %arg3[%c0_49, %c0_50, %c0_51] : memref<1x16x128xbf16, #tpu.memory_space<vmem>>, vector<1x16x7xbf16>
    %43 = vector.shape_cast %42 : vector<1x16x7xbf16> to vector<16x7xbf16>
    %c112_52 = arith.constant 112 : index
    %c121 = arith.constant 121 : index
    %44 = vector.load %arg9[%c112_52, %c121] : memref<176x128xbf16, #tpu.memory_space<vmem>>, vector<16x7xbf16>
    tpu.vector_store %arg9[%c112_52, %c121], %43 {strides = array<i32>} : memref<176x128xbf16, #tpu.memory_space<vmem>>, vector<16x7xbf16>,
    %c0_53 = arith.constant 0 : index
    %c0_54 = arith.constant 0 : index
    %c8 = arith.constant 8 : index
    %45 = vector.load %arg2[%c0_53, %c0_54, %c8] : memref<1x16x128xbf16, #tpu.memory_space<vmem>>, vector<1x16x120xbf16>
    %46 = vector.shape_cast %45 : vector<1x16x120xbf16> to vector<16x120xbf16>
    %c128 = arith.constant 128 : index
    %c0_55 = arith.constant 0 : index
    %47 = vector.load %arg9[%c128, %c0_55] : memref<176x128xbf16, #tpu.memory_space<vmem>>, vector<16x120xbf16>
    tpu.vector_store %arg9[%c128, %c0_55], %46 {strides = array<i32>} : memref<176x128xbf16, #tpu.memory_space<vmem>>, vector<16x120xbf16>,
    %c0_56 = arith.constant 0 : index
    %c0_57 = arith.constant 0 : index
    %c0_58 = arith.constant 0 : index
    %48 = vector.load %arg3[%c0_56, %c0_57, %c0_58] : memref<1x16x128xbf16, #tpu.memory_space<vmem>>, vector<1x16x8xbf16>
    %49 = vector.shape_cast %48 : vector<1x16x8xbf16> to vector<16x8xbf16>
    %c128_59 = arith.constant 128 : index
    %c120 = arith.constant 120 : index
    %50 = vector.load %arg9[%c128_59, %c120] : memref<176x128xbf16, #tpu.memory_space<vmem>>, vector<16x8xbf16>
    tpu.vector_store %arg9[%c128_59, %c120], %49 {strides = array<i32>} : memref<176x128xbf16, #tpu.memory_space<vmem>>, vector<16x8xbf16>,
    %c0_60 = arith.constant 0 : index
    %c0_61 = arith.constant 0 : index
    %c9 = arith.constant 9 : index
    %51 = vector.load %arg2[%c0_60, %c0_61, %c9] : memref<1x16x128xbf16, #tpu.memory_space<vmem>>, vector<1x16x119xbf16>
    %52 = vector.shape_cast %51 : vector<1x16x119xbf16> to vector<16x119xbf16>
    %c144 = arith.constant 144 : index
    %c0_62 = arith.constant 0 : index
    %53 = vector.load %arg9[%c144, %c0_62] : memref<176x128xbf16, #tpu.memory_space<vmem>>, vector<16x119xbf16>
    tpu.vector_store %arg9[%c144, %c0_62], %52 {strides = array<i32>} : memref<176x128xbf16, #tpu.memory_space<vmem>>, vector<16x119xbf16>,
    %c0_63 = arith.constant 0 : index
    %c0_64 = arith.constant 0 : index
    %c0_65 = arith.constant 0 : index
    %54 = vector.load %arg3[%c0_63, %c0_64, %c0_65] : memref<1x16x128xbf16, #tpu.memory_space<vmem>>, vector<1x16x9xbf16>
    %55 = vector.shape_cast %54 : vector<1x16x9xbf16> to vector<16x9xbf16>
    %c144_66 = arith.constant 144 : index
    %c119 = arith.constant 119 : index
    %56 = vector.load %arg9[%c144_66, %c119] : memref<176x128xbf16, #tpu.memory_space<vmem>>, vector<16x9xbf16>
    tpu.vector_store %arg9[%c144_66, %c119], %55 {strides = array<i32>} : memref<176x128xbf16, #tpu.memory_space<vmem>>, vector<16x9xbf16>,
    %c0_67 = arith.constant 0 : index
    %c0_68 = arith.constant 0 : index
    %c10 = arith.constant 10 : index
    %57 = vector.load %arg2[%c0_67, %c0_68, %c10] : memref<1x16x128xbf16, #tpu.memory_space<vmem>>, vector<1x16x118xbf16>
    %58 = vector.shape_cast %57 : vector<1x16x118xbf16> to vector<16x118xbf16>
    %c160 = arith.constant 160 : index
    %c0_69 = arith.constant 0 : index
    %59 = vector.load %arg9[%c160, %c0_69] : memref<176x128xbf16, #tpu.memory_space<vmem>>, vector<16x118xbf16>
    tpu.vector_store %arg9[%c160, %c0_69], %58 {strides = array<i32>} : memref<176x128xbf16, #tpu.memory_space<vmem>>, vector<16x118xbf16>,
    %c0_70 = arith.constant 0 : index
    %c0_71 = arith.constant 0 : index
    %c0_72 = arith.constant 0 : index
    %60 = vector.load %arg3[%c0_70, %c0_71, %c0_72] : memref<1x16x128xbf16, #tpu.memory_space<vmem>>, vector<1x16x10xbf16>
    %61 = vector.shape_cast %60 : vector<1x16x10xbf16> to vector<16x10xbf16>
    %c160_73 = arith.constant 160 : index
    %c118 = arith.constant 118 : index
    %62 = vector.load %arg9[%c160_73, %c118] : memref<176x128xbf16, #tpu.memory_space<vmem>>, vector<16x10xbf16>
    tpu.vector_store %arg9[%c160_73, %c118], %61 {strides = array<i32>} : memref<176x128xbf16, #tpu.memory_space<vmem>>, vector<16x10xbf16>,
    %c0_74 = arith.constant 0 : index
    %c0_75 = arith.constant 0 : index
    %63 = vector.load %arg4[%c0_74, %c0_75] : memref<12x176xbf16, #tpu.memory_space<vmem>>, vector<12x176xbf16>
    %c0_76 = arith.constant 0 : index
    %c0_77 = arith.constant 0 : index
    %64 = vector.load %arg9[%c0_76, %c0_77] : memref<176x128xbf16, #tpu.memory_space<vmem>>, vector<176x128xbf16>
    %cst = arith.constant dense<0.000000e+00> : vector<12x128xf32>
    %65 = tpu.matmul %63, %64, %cst {dimension_numbers = #tpu.dot_dimension_numbers<[1], [0], [0], [1], [0, 0, 1, 1], [], []>} : vector<12x176xbf16>, vector<176x128xbf16>, vector<12x128xf32> -> vector<12x128xf32>
    %cst_78 = arith.constant 2.000000e+01 : f32
    %66 = vector.broadcast %cst_78 : f32 to vector<12x128xf32>
    %67 = arith.minimumf %65, %66 : vector<12x128xf32>
    %68 = math.exp %67 : vector<12x128xf32>
    %cst_79 = arith.constant 1.000000e+00 : f32
    %69 = vector.broadcast %cst_79 : f32 to vector<12x128xf32>
    %70 = arith.addf %69, %68 : vector<12x128xf32>
    %cst_80 = arith.constant 1.000000e+00 : f32
    %71 = vector.broadcast %cst_80 : f32 to vector<12x128xf32>
    %72 = arith.addf %71, %68 : vector<12x128xf32>
    %73 = arith.mulf %70, %72 : vector<12x128xf32>
    %cst_81 = arith.constant 1.000000e+00 : f32
    %74 = vector.broadcast %cst_81 : f32 to vector<12x128xf32>
    %75 = arith.subf %73, %74 : vector<12x128xf32>
    %cst_82 = arith.constant 1.000000e+00 : f32
    %76 = vector.broadcast %cst_82 : f32 to vector<12x128xf32>
    %77 = arith.addf %73, %76 : vector<12x128xf32>
    %78 = arith.divf %75, %77 : vector<12x128xf32>
    %79 = arith.mulf %65, %78 : vector<12x128xf32>
    %c0_83 = arith.constant 0 : index
    %c0_84 = arith.constant 0 : index
    %80 = vector.load %arg6[%c0_83, %c0_84] : memref<8x12xbf16, #tpu.memory_space<vmem>>, vector<8x12xbf16>
    %81 = arith.truncf %79 : vector<12x128xf32> to vector<12x128xbf16>
    %cst_85 = arith.constant dense<0.000000e+00> : vector<8x128xf32>
    %82 = tpu.matmul %80, %81, %cst_85 {dimension_numbers = #tpu.dot_dimension_numbers<[1], [0], [0], [1], [0, 0, 1, 1], [], []>} : vector<8x12xbf16>, vector<12x128xbf16>, vector<8x128xf32> -> vector<8x128xf32>
    %c0_86 = arith.constant 0 : index
    %c0_87 = arith.constant 0 : index
    %83 = vector.load %arg7[%c0_86, %c0_87] : memref<8x1xf32, #tpu.memory_space<vmem>>, vector<8x1xf32>
    %84 = vector.broadcast %83 : vector<8x1xf32> to vector<8x128xf32>
    %85 = arith.addf %82, %84 : vector<8x128xf32>
    %c0_88 = arith.constant 0 : index
    %c0_89 = arith.constant 0 : index
    %c0_90 = arith.constant 0 : index
    %86 = vector.load %arg8[%c0_88, %c0_89, %c0_90] : memref<1x8x128xf32, #tpu.memory_space<vmem>>, vector<1x8x128xf32>
    %87 = vector.shape_cast %86 : vector<1x8x128xf32> to vector<8x128xf32>
    %88 = vector.shape_cast %85 : vector<8x128xf32> to vector<1x8x128xf32>
    tpu.vector_store %arg8[%c0_88, %c0_89, %c0_90], %88 {strides = array<i32>} : memref<1x8x128xf32, #tpu.memory_space<vmem>>, vector<1x8x128xf32>,
    return
  }
  func.func @transform_0(%arg0: i32, %arg1: i32) -> (i32, i32, i32) {
    %c0_i32 = arith.constant 0 : i32
    %c0_i32_0 = arith.constant 0 : i32
    return %arg0, %c0_i32, %arg1 : i32, i32, i32
  }
  func.func @transform_1(%arg0: i32, %arg1: i32) -> (i32, i32, i32) {
    %c1_i32 = arith.constant 1 : i32
    %0 = arith.addi %arg1, %c1_i32 : i32
    %c1_i32_0 = arith.constant 1 : i32
    %1 = arith.muli %0, %c1_i32_0 : i32
    %c0_i32 = arith.constant 0 : i32
    %c0_i32_1 = arith.constant 0 : i32
    return %arg0, %c0_i32, %1 : i32, i32, i32
  }
  func.func @transform_2(%arg0: i32, %arg1: i32) -> (i32, i32) {
    %c0_i32 = arith.constant 0 : i32
    %c0_i32_0 = arith.constant 0 : i32
    %c0_i32_1 = arith.constant 0 : i32
    return %c0_i32, %c0_i32_0 : i32, i32
  }
  func.func @transform_3(%arg0: i32, %arg1: i32) -> (i32, i32) {
    %c0_i32 = arith.constant 0 : i32
    %c0_i32_0 = arith.constant 0 : i32
    %c0_i32_1 = arith.constant 0 : i32
    return %c0_i32, %c0_i32_0 : i32, i32
  }
  func.func @transform_4(%arg0: i32, %arg1: i32) -> (i32, i32) {
    %c0_i32 = arith.constant 0 : i32
    %c0_i32_0 = arith.constant 0 : i32
    %c0_i32_1 = arith.constant 0 : i32
    return %c0_i32, %c0_i32_0 : i32, i32
  }
  func.func @transform_5(%arg0: i32, %arg1: i32) -> (i32, i32) {
    %c0_i32 = arith.constant 0 : i32
    %c0_i32_0 = arith.constant 0 : i32
    %c0_i32_1 = arith.constant 0 : i32
    return %c0_i32, %c0_i32_0 : i32, i32
  }
  func.func @transform_6(%arg0: i32, %arg1: i32) -> (i32, i32, i32) {
    %c0_i32 = arith.constant 0 : i32
    %c0_i32_0 = arith.constant 0 : i32
    return %arg0, %c0_i32, %arg1 : i32, i32, i32
  }
}

</mosaic_0001>

<bundles_post_ra>
// kernel: tpu_custom_call.1
= control target key start
LH: loop header
LB: loop body
LE: loop exit
PB: predicated region body
PF: predicated region fallthrough
CT: control target
= control target key end

     0   :  { %s1509_s0 = inlined_call_operand.hbm [shape: bf16[2,16,256], index: 0, kind: input, shape index: {}]   ;;  %s1510_s1 = inlined_call_operand.hbm [shape: bf16[2,16,256], index: 1, kind: input, shape index: {}]   ;;  %s1511_s2 = inlined_call_operand.vmem [shape: bf16[12,176], index: 2, kind: input, shape index: {}]   ;;  %s1512_s3 = inlined_call_operand.vmem [shape: f32[12,1], index: 3, kind: input, shape index: {}]   ;;  %s1513_s4 = inlined_call_operand.vmem [shape: bf16[8,12], index: 4, kind: input, shape index: {}]   ;;  %s1514_s5 = inlined_call_operand.vmem [shape: f32[8,1], index: 5, kind: input, shape index: {}]   ;;  %s1515_s6 = inlined_call_operand.hbm [shape: f32[2,8,128], index: 6, kind: output, shape index: {}]  }
   0x1   :  { %1521 = sst [smem:[#allocation14_spill]] %s1509_s0 }
   0x2   :  { %11 = vsyncpa [#allocation4], 0 }
   0x3   :  { %13 = vsyncpa [#allocation4 + $0x1], 0 }
   0x4   :  { %14 = vsyncpa [#allocation7], 0 }
   0x5   :  { %16 = vsyncpa [#allocation7 + $0x1], 0 }
   0x6   :  { %17 = vsyncpa [#allocation5], 0 }
   0x7   :  { %19 = vsyncpa [#allocation5 + $0x1], 0  ;;  %s1224_s21 = smov 0   ;;  %s1226_s22 = smov 0  }
   0x8   :  { %s1228_s3 = smov 0   ;;  %s1230_s23 = smov 0  }
   0x9   :  { %s1232_s24 = smov 0   ;;  %s1234_s25 = smov 0  }
   0xa LB: > { %s850_s26 = sadd.s32 4294967295, %s1168_s25   ;;  %s851_s27 = sadd.s32 4294967294, %s1168_s25   ;;  %s1168_s25 = sphi %s1234_s25, %s25_s25   ;;  %s1164_s24 = sphi %s1232_s24, %s1543_s24   ;;  %s1160_s23 = sphi %s1230_s23, %s1542_s23   ;;  %s1156_s3 = sphi %s1228_s3, %s1541_s3   ;;  %s1152_s22 = sphi %s1226_s22, %s1540_s22   ;;  %s1148_s21 = sphi %s1224_s21, %s1539_s21  }
   0xb   : > { %s37_s28 = sadd.s32 1, %s1164_s24  ;;  %s46_s29 = sadd.s32 1, %s1156_s3 }
   0xc   : > { %p39_p0 = scmp.ge.s32.totalorder %s37_s28, 2  ;;  %p53_p1 = scmp.ne.s32.totalorder %s1156_s3, %s1152_s22 }
   0xd   : > { %p54_p2 = scmp.eq.s32.totalorder %s1168_s25, 0  ;;  %p59_p3 = scmp.ne.s32.totalorder %s1152_s22, %s1148_s21 }
   0xe   : > { %s1545_s28 = smov (%p39_p0, %s37_s28), 0  ;;  %p60_p5 = scmp.eq.s32.totalorder %s850_s26, 0 }
   0xf   : > { %1522 = sst [smem:[#allocation12_spill]] %s1545_s28  ;;  %p1265_p4 = por %p54_p2, %p53_p1 }
  0x10   : > { %s41_s7 = ssub.s32 %s1164_s24, %s1545_s28  ;;  %p199_p6 = scmp.eq.s32.totalorder %s850_s26, 1 }
  0x11   : > { %p44_p7 = scmp.eq.s32.totalorder %s41_s7, 0  ;;  %p1271_p8 = por %p60_p5, %p59_p3 }
  0x12   : > { %p1275_p9 = por %p199_p6, %p53_p1  ;;  %p205_p10 = scmp.eq.s32.totalorder %s851_s27, 1 }
  0x13   : > { %s1524_s8 = scalar_select %p1271_p8, 1, 0 }
  0x14   : > { %s1525_s9 = scalar_select %p1275_p9, 1, 0 }
  0x15   : > { %s1280_s10 = scalar_select %p44_p7, %s1156_s3, %s46_s29  }
  0x16   : > { %p1282_p11 = por %p205_p10, %p59_p3  ;;  %p922_p13 = scmp.lt.s32.totalorder %s1168_s25, 2 }
  0x17   : > { %1526 = sst [smem:[#allocation13_spill]] %s1280_s10  ;;  %s1289_s12 = sand.u32 1, %s1156_s3  }
  0x18   : > { %s1527_s11 = scalar_select %p1282_p11, 1, 0 }
  0x19   : > { %s1517_s13 = sshll.u32 %s1289_s12, 3  ;;  %s895_s14 = sshll.u32 %s1164_s24, 8 }
  0x1a   : > { %s1528_s0 = sld [smem:[#allocation14_spill]]  ;;  %s241_s18 = scalar_lea.vmem [#allocation3], %s1517_s13 }
  0x1b   : > { %s249_s19 = sshll.u32 %s241_s18, 4  ;;  %p1306_p0 = pnand %p922_p13, %p1265_p4  ;;  %s1302_s19 = int_to_ptr.vmem [resolvable:$true] %s249_s19 }
  0x1c   : > { %s238_s26 = scalar_lea.sflag [#allocation4], %s1289_s12 }
  0x1d   : > { %p1023_p2 = pneg %p1306_p0 }
  0x20   : > { %s1298_s17 = scalar_lea.hbm %s1528_s0, %s895_s14  ;;  %s1026_s15 = scalar_lea.hbm %s1528_s0, 512 }
  0x21   : > { %s1021_s27 = scalar_lea.hbm %s1298_s17, 128  ;;  %p1027_p4 = scmp.lt.u32.totalorder %s1298_s17, %s1528_s0 }
  0x22   : > { %p1022_p1 = scmp.ne.s32.totalorder %s1298_s17, %s1021_s27  ;;  %p1028_p6 = scmp.lt.u32.totalorder %s1026_s15, %s1021_s27 }
  0x23   : > { %p1030_p10 = scmp.lt.u32.totalorder %s1021_s27, %s1298_s17 }
  0x24   : > { %p1024_p3 = pnand %p1023_p2, %p1022_p1  ;;  %p1029_p7 = por %p1028_p6, %p1027_p4 }
  0x26   : > { %p1025_p5 = pneg %p1024_p3  ;;  %p1031_p13 = por %p1030_p10, %p1029_p7 }
  0x28   : > { %p1032_p12 = pnand %p1031_p13, %p1025_p5 }
  0x2a   : > { %1035 = shalt.err (!%p1032_p12)
}
  0x2b   : > { %s1036_s18 = scalar_lea.vmem %s1302_s19, 128  ;;  %s1170_s29 = smov [#allocation3]  }
  0x2c   : > { %p1037_p1 = scmp.ne.s32.totalorder %s1302_s19, %s1036_s18  ;;  %s1041_s7 = sshll.u32 %s1170_s29, 4  ;;  %s1042_s7 = int_to_ptr.vmem [resolvable:$false] %s1041_s7 }
  0x2d   : > { %s1043_s30 = scalar_lea.vmem %s1042_s7, 256  ;;  %p1044_p9 = scmp.lt.s32.totalorder %s1302_s19, %s1042_s7 }
  0x2e   : > { %p1039_p3 = pnand %p1037_p1, %p1023_p2  ;;  %p1045_p4 = scmp.lt.s32.totalorder %s1043_s30, %s1036_s18 }
  0x30   : > { %p1040_p11 = pneg %p1039_p3  ;;  %p1046_p6 = por %p1045_p4, %p1044_p9 }
  0x32   : > { %p1047_p7 = pnand %p1046_p6, %p1040_p11 }
  0x34   : > { %1050 = shalt.err (!%p1047_p7)
}
  0x35   : > { %s1519_s27 = smov 128   ;;  %s1172_s15 = smov 64  }
  0x36   : > { %s1173_s16 = smov 4   ;;  %p860_p9 = scmp.ge.s32.totalorder %s1168_s25, 1 }
  0x37   : > { %914 = dma.hbm_to_vmem [thread:$0]  (!%p1306_p0), %s1298_s17, 128, %s1302_s19, %s238_s26, %s1519_s27, %s1172_s15, %s1173_s16  }
  0x38   : > { %p280_p11 = scmp.lt.s32.totalorder %s1168_s25, 3  ;;  %s783_s30 = scalar_lea.hbm %s1510_s1, %s895_s14 }
  0x39   : > { %s1352_s13 = scalar_lea.hbm %s783_s30, 64  ;;  %s1531_s0 = sshll.u32 %s1289_s12, 3 }
  0x3a   : > { %p1343_p12 = pnand %p860_p9, %p280_p11  ;;  %s263_s28 = scalar_lea.vmem [#allocation6], %s1531_s0 }
  0x3b   : > { %s272_s10 = sshll.u32 %s263_s28, 4  ;;  %s260_s17 = scalar_lea.sflag [#allocation7], %s1289_s12  ;;  %s1356_s10 = int_to_ptr.vmem [resolvable:$true] %s272_s10 }
  0x3c   : > { %s1081_s19 = scalar_lea.hbm %s783_s30, 192  ;;  %s1056_s14 = scalar_lea.hbm %s1510_s1, 512 }
  0x3d   : > { %p1052_p5 = scmp.ne.s32.totalorder %s1352_s13, %s1081_s19  ;;  %p1057_p1 = scmp.lt.u32.totalorder %s1352_s13, %s1510_s1 }
  0x3e   : > { %p1058_p3 = scmp.lt.u32.totalorder %s1056_s14, %s1081_s19  ;;  %p1060_p6 = scmp.lt.u32.totalorder %s1081_s19, %s1352_s13 }
  0x3f   : > { %p1054_p10 = pnand %p1052_p5, %p1023_p2 }
  0x40   : > { %p1059_p4 = por %p1058_p3, %p1057_p1 }
  0x41   : > { %p1055_p13 = pneg %p1054_p10 }
  0x42   : > { %p1061_p7 = por %p1060_p6, %p1059_p4 }
  0x44   : > { %p1062_p9 = pnand %p1061_p7, %p1055_p13 }
  0x46   : > { %1065 = shalt.err (!%p1062_p9)
}
  0x47   : > { %s1066_s0 = scalar_lea.vmem %s1356_s10, 128  ;;  %s1174_s28 = smov [#allocation6]  }
  0x48   : > { %p1067_p11 = scmp.ne.s32.totalorder %s1356_s10, %s1066_s0  ;;  %s1071_s30 = sshll.u32 %s1174_s28, 4  ;;  %s1072_s30 = int_to_ptr.vmem [resolvable:$false] %s1071_s30 }
  0x49   : > { %s1073_s27 = scalar_lea.vmem %s1072_s30, 256  ;;  %p1074_p8 = scmp.lt.s32.totalorder %s1356_s10, %s1072_s30 }
  0x4a   : > { %p1069_p5 = pnand %p1067_p11, %p1023_p2  ;;  %p1075_p1 = scmp.lt.s32.totalorder %s1073_s27, %s1066_s0 }
  0x4c   : > { %p1070_p10 = pneg %p1069_p5  ;;  %p1076_p3 = por %p1075_p1, %p1074_p8 }
  0x4e   : > { %p1077_p4 = pnand %p1076_p3, %p1070_p10 }
  0x50   : > { %1080 = shalt.err (!%p1077_p4)
}
  0x51   : > { %s1532_s19 = smov 128   ;;  %284 = sbr.rel (%p1343_p12) target bundleno = 743 (0x2e7), region = 44 }
  0x52   : > { %917 = dma.hbm_to_vmem [thread:$0]  (!%p1306_p0), %s1352_s13, 128, %s1356_s10, %s260_s17, %s1532_s19, %s1172_s15, %s1173_s16  }
  0x53   : > { %s1389_s26 = sand.u32 (!%p1343_p12), 1, %s1152_s22   ;;  %p1533_p8 = scmp.ne.s32.totalorder (!%p1343_p12), %s1524_s8, 0 }
  0x54   : > { %s1392_s29 = sshll.u32 (!%p1343_p12), %s1389_s26, 3  ;;  %s287_s20 = scalar_lea.sflag (!%p1343_p12), [#allocation4], %s1389_s26 }
  0x55   : > { %s1396_s14 = scalar_lea.vmem (!%p1343_p12), [#allocation3], %s1392_s29 }
  0x58   : > { %1135 = dma.done.wait (%p1533_p8), %s287_s20, 128  }
  0x59   : > { %1137 = vsyncadd (%p1533_p8), %s287_s20, 4294967168  ;;  %s296_s10 = scalar_lea.sflag [#allocation7], %s1389_s26  ;;  %s1404_s12 = scalar_lea.vmem [#allocation6], %s1392_s29 }
  0x5a   : > { %1139 = dma.done.wait (%p1533_p8), %s296_s10, 128  }
  0x5b   : > { %1141 = vsyncadd (%p1533_p8), %s296_s10, 4294967168  ;;  %v1175_v0 = vmov 0   ;;  %v989_v1 = vld [vmem:[%s1396_s14] sm:$0xff]   ;;  %s1176_s13 = smov 127   ;;  %v991_v3 = vld [vmem:[%s1404_s12] sm:$0xff]   ;;  %s1177_s8 = smov 126  }
  0x5c   : > { %610 = vmatprep.subr.bf16.mxu0 %v1175_v0  ;;  %988 = vset.pattern.permute.xlu0 %v1175_v0  ;;  %v990_v2 = vld [vmem:[%s1396_s14] sm:$0xff]   ;;  %v992_v4 = vld [vmem:[%s1404_s12] sm:$0xff]   ;;  %s1178_s15 = smov 125   ;;  %s1179_s16 = smov 124   ;;  %vm606_vm0 = vcmask 392192   ;;  %vm354_vm1 = vcmask 1039360  }
  0x5d   : > { %351 = vrot.lane.b32.xlu0 %v989_v1, %s1176_s13  ;;  %375 = vrot.lane.b32.xlu1 %v990_v2, %s1177_s8  ;;  %v993_v5 = vld [vmem:[%s1396_s14] sm:$0xff]   ;;  %v994_v6 = vld [vmem:[%s1404_s12] sm:$0xff]   ;;  %s1180_s18 = smov 123   ;;  %s1181_s17 = smov 122   ;;  %vm378_vm2 = vcmask 1031168   ;;  %vm366_vm3 = vcmask 1048568  }
  0x5e   : > { %v995_v7 = vld [vmem:[%s1396_s14] sm:$0xff]   ;;  %v996_v8 = vld [vmem:[%s1404_s12] sm:$0xff]   ;;  %s1182_s7 = smov 121   ;;  %s1183_s0 = smov 120   ;;  %vm390_vm4 = vcmask 1048560   ;;  %vm402_vm5 = vcmask 1022976  }
  0x5f   : > { %v997_v9 = vld [vmem:[%s1396_s14] sm:$0xff]   ;;  %v998_v10 = vld [vmem:[%s1404_s12] sm:$0xff]   ;;  %s1184_s28 = smov 119   ;;  %s1185_s19 = smov 118   ;;  %vm414_vm6 = vcmask 1048552   ;;  %vm426_vm7 = vcmask 1014784  }
  0x60   : > { %v999_v11 = vld [vmem:[%s1396_s14] sm:$0xff]   ;;  %v1000_v12 = vld [vmem:[%s1404_s12] sm:$0xff]   ;;  %vm438_vm8 = vcmask 1048544   ;;  %vm450_vm9 = vcmask 1006592   ;;  %vm462_vm10 = vcmask 1048536   ;;  %vm474_vm11 = vcmask 998400  }
  0x61   : > { %363 = vrot.lane.b32.xlu0 %v991_v3, %s1176_s13  ;;  %387 = vrot.lane.b32.xlu1 %v992_v4, %s1177_s8  ;;  %v1009_v13 = vld [vmem:[%s1396_s14] sm:$0xff]   ;;  %v1002_v15 = vld [vmem:[%s1404_s12] sm:$0xff]   ;;  %vm486_vm12 = vcmask 1048528   ;;  %vm498_vm13 = vcmask 990208   ;;  %vm510_vm14 = vcmask 1048520   ;;  %vm522_vm15 = vcmask 982016  }
  0x62   : > { %v1001_v14 = vld [vmem:[%s1396_s14] sm:$0xff]   ;;  %611 = vmatpush1.bf16.msra.mxu0 %v1009_v13  ;;  %v1004_v17 = vld [vmem:[%s1404_s12] sm:$0xff]   ;;  %v1186_v54 = vmov 0.0   ;;  %p1534_p2 = scmp.ne.s32.totalorder %s1525_s9, 0 }
  0x63   : > { %612 = vmatprep.subr.bf16.mxu0 %v1175_v0  ;;  %v1003_v16 = vld [vmem:[%s1396_s14] sm:$0xff]   ;;  %v1006_v19 = vld [vmem:[%s1404_s12] sm:$0xff]   ;;  %899 = vmatprep.subr.bf16.mxu1 %v1186_v54 }
  0x64   : > { %v1005_v18 = vld [vmem:[%s1396_s14] sm:$0xff]   ;;  %v1008_v21 = vld [vmem:[%s1404_s12] sm:$0xff]  }
  0x65   : > { %399 = vrot.lane.b32.xlu0 %v993_v5, %s1178_s15  ;;  %411 = vrot.lane.b32.xlu1 %v994_v6, %s1178_s15  ;;  %v1007_v20 = vld [vmem:[%s1396_s14] sm:$0xff]   ;;  %s892_s15 = sshll.u32 %s1160_s23, 7 }
  0x66   : > { %v1012_v22 = vld [vmem:[%s1511_s2 + $0x4] ss:$8 sps:$4 sm:$0x3f]   ;;  %v1010_v53 = vld [vmem:[%s1511_s2] ss:$8 sps:$4 sm:$0x3f]  }
  0x67   : > { %887 = vmatprep.mubr.msk.bf16.mxu0 %vm606_vm0, %v1012_v22  ;;  %vm534_vm0 = vcmask 1048512   ;;  %v673_v55 = vld [vmem:[%s1514_s5] sm:$0xff] }
  0x69   : > { %423 = vrot.lane.b32.xlu0 %v995_v7, %s1179_s16  ;;  %435 = vrot.lane.b32.xlu1 %v996_v8, %s1179_s16  ;;  %s332_s16 = scalar_lea.vmem [#allocation8], %s1392_s29  ;;  %s1188_s29 = smov [#allocation8]  }
  0x6a   : > { %s1086_s30 = sshll.u32 %s1188_s29, 4  ;;  %s1087_s30 = int_to_ptr.vmem [resolvable:$false] %s1086_s30 }
  0x6b   : > { %s1088_s27 = scalar_lea.vmem %s1087_s30, 256 }
  0x6d   : > { %447 = vrot.lane.b32.xlu0 %v997_v9, %s1180_s18  ;;  %459 = vrot.lane.b32.xlu1 %v998_v10, %s1180_s18  ;;  %s743_s18 = sshll.u32 %s332_s16, 4  ;;  %s1462_s18 = int_to_ptr.vmem [resolvable:$true] %s743_s18 }
  0x6e   : > { %s1082_s23 = scalar_lea.vmem %s1462_s18, 128  ;;  %p1089_p6 = scmp.lt.s32.totalorder %s1462_s18, %s1087_s30 }
  0x6f   : > { %p1083_p0 = scmp.ne.s32.totalorder %s1462_s18, %s1082_s23  ;;  %p1090_p7 = scmp.lt.s32.totalorder %s1088_s27, %s1082_s23 }
  0x71   : > { %471 = vrot.lane.b32.xlu0 %v999_v11, %s1181_s17  ;;  %483 = vrot.lane.b32.xlu1 %v1000_v12, %s1181_s17  ;;  %p1084_p12 = pnand %p1083_p0, %p1534_p2  ;;  %p1091_p9 = por %p1090_p7, %p1089_p6 }
  0x73   : > { %p1085_p13 = pneg %p1084_p12 }
  0x75   : > { %495 = vrot.lane.b32.xlu0 %v1001_v14, %s1182_s7  ;;  %507 = vrot.lane.b32.xlu1 %v1002_v15, %s1182_s7  ;;  %p1092_p11 = pnand %p1091_p9, %p1085_p13 }
  0x79   : > { %519 = vrot.lane.b32.xlu0 %v1003_v16, %s1183_s0  ;;  %531 = vrot.lane.b32.xlu1 %v1004_v17, %s1183_s0  ;;  %s1460_s0 = scalar_lea.hbm %s1515_s6, %s892_s15 }
  0x7d   : > { %543 = vrot.lane.b32.xlu0 %v1005_v18, %s1184_s28  ;;  %555 = vrot.lane.b32.xlu1 %v1006_v19, %s1184_s28  ;;  %v671_v18 = vld [vmem:[%s1513_s4] sm:$0xf]  ;;  %s729_s28 = scalar_lea.sflag [#allocation5], %s1389_s26 }
  0x81   : > { %567 = vrot.lane.b32.xlu0 %v1007_v20, %s1185_s19  ;;  %579 = vrot.lane.b32.xlu1 %v1008_v21, %s1185_s19 }
  0x85   : > { %676 = vperm.xlu0 %988, %v673_v55  }
  0xcf   : > { %v352_v23 = vpop.permute.xlu0 %351  ;;  %v376_v24 = vpop.permute.xlu1 %375 }
  0xd0   : > { %355 = vst.msk [vmem:[#allocation2 + $0x8] sm:$0xff] %vm354_vm1, %v352_v23  ;;  %vm546_vm1 = vcmask 973824  }
  0xd1   : > { %379 = vst.msk [vmem:[#allocation2 + $0x10] sm:$0xff] %vm378_vm2, %v376_v24  ;;  %vm558_vm2 = vcmask 1048504  }
  0xd3   : > { %v364_v25 = vpop.permute.xlu0 %363  ;;  %v388_v26 = vpop.permute.xlu1 %387 }
  0xd4   : > { %367 = vst.msk [vmem:[#allocation2 + $0x8] sm:$0xff] %vm366_vm3, %v364_v25  ;;  %vm570_vm3 = vcmask 965632  }
  0xd5   : > { %391 = vst.msk [vmem:[#allocation2 + $0x10] sm:$0xff] %vm390_vm4, %v388_v26  ;;  %vm582_vm4 = vcmask 1048496  }
  0xd7   : > { %v400_v27 = vpop.permute.xlu0 %399  ;;  %v412_v28 = vpop.permute.xlu1 %411 }
  0xd8   : > { %403 = vst.msk [vmem:[#allocation2 + $0x18] sm:$0xff] %vm402_vm5, %v400_v27  ;;  %vm1187_vm5 = vmmov 0  }
  0xd9   : > { %415 = vst.msk [vmem:[#allocation2 + $0x18] sm:$0xff] %vm414_vm6, %v412_v28  ;;  %901 = vmatprep.mubr.msk.bf16.mxu1 %vm1187_vm5, %v1186_v54  ;;  %vm683_vm6 = vcmask 1045504  }
  0xdb   : > { %v587_v29 = vld [vmem:[#allocation2 + $0x8] sm:$0xff]  ;;  %v424_v30 = vpop.permute.xlu0 %423  ;;  %v436_v31 = vpop.permute.xlu1 %435 }
  0xdc   : > { %613 = vmatpush1.bf16.msra.mxu0 %v587_v29  ;;  %427 = vst.msk [vmem:[#allocation2 + $0x20] sm:$0xff] %vm426_vm7, %v424_v30  ;;  %v588_v32 = vld [vmem:[#allocation2 + $0x10] sm:$0xff]  ;;  %vm679_vm7 = vcmask 97280  }
  0xdd   : > { %439 = vst.msk [vmem:[#allocation2 + $0x20] sm:$0xff] %vm438_vm8, %v436_v31  ;;  %614 = vmatprep.subr.bf16.mxu0 %v1175_v0 }
  0xdf   : > { %v448_v33 = vpop.permute.xlu0 %447  ;;  %v460_v34 = vpop.permute.xlu1 %459 }
  0xe0   : > { %615 = vmatpush1.bf16.msra.mxu0 %v588_v32  ;;  %451 = vst.msk [vmem:[#allocation2 + $0x28] sm:$0xff] %vm450_vm9, %v448_v33  ;;  %v589_v35 = vld [vmem:[#allocation2 + $0x18] sm:$0xff] }
  0xe1   : > { %463 = vst.msk [vmem:[#allocation2 + $0x28] sm:$0xff] %vm462_vm10, %v460_v34  ;;  %616 = vmatprep.subr.bf16.mxu0 %v1175_v0 }
  0xe3   : > { %v472_v36 = vpop.permute.xlu0 %471  ;;  %v484_v37 = vpop.permute.xlu1 %483 }
  0xe4   : > { %617 = vmatpush1.bf16.msra.mxu0 %v589_v35  ;;  %475 = vst.msk [vmem:[#allocation2 + $0x30] sm:$0xff] %vm474_vm11, %v472_v36  ;;  %v590_v38 = vld [vmem:[#allocation2 + $0x20] sm:$0xff] }
  0xe5   : > { %487 = vst.msk [vmem:[#allocation2 + $0x30] sm:$0xff] %vm486_vm12, %v484_v37  ;;  %618 = vmatprep.subr.bf16.mxu0 %v1175_v0 }
  0xe7   : > { %v496_v39 = vpop.permute.xlu0 %495  ;;  %v508_v40 = vpop.permute.xlu1 %507 }
  0xe8   : > { %619 = vmatpush1.bf16.msra.mxu0 %v590_v38  ;;  %499 = vst.msk [vmem:[#allocation2 + $0x38] sm:$0xff] %vm498_vm13, %v496_v39  ;;  %v591_v41 = vld [vmem:[#allocation2 + $0x28] sm:$0xff] }
  0xe9   : > { %511 = vst.msk [vmem:[#allocation2 + $0x38] sm:$0xff] %vm510_vm14, %v508_v40  ;;  %620 = vmatprep.subr.bf16.mxu0 %v1175_v0 }
  0xeb   : > { %v520_v42 = vpop.permute.xlu0 %519  ;;  %v532_v43 = vpop.permute.xlu1 %531 }
  0xec   : > { %621 = vmatpush1.bf16.msra.mxu0 %v591_v41  ;;  %523 = vst.msk [vmem:[#allocation2 + $0x40] sm:$0xff] %vm522_vm15, %v520_v42  ;;  %v592_v44 = vld [vmem:[#allocation2 + $0x30] sm:$0xff] }
  0xed   : > { %535 = vst.msk [vmem:[#allocation2 + $0x40] sm:$0xff] %vm534_vm0, %v532_v43  ;;  %622 = vmatprep.subr.bf16.mxu0 %v1175_v0 }
  0xef   : > { %v544_v45 = vpop.permute.xlu0 %543  ;;  %v556_v46 = vpop.permute.xlu1 %555 }
  0xf0   : > { %623 = vmatpush1.bf16.msra.mxu0 %v592_v44  ;;  %547 = vst.msk [vmem:[#allocation2 + $0x48] sm:$0xff] %vm546_vm1, %v544_v45  ;;  %v593_v47 = vld [vmem:[#allocation2 + $0x38] sm:$0xff] }
  0xf1   : > { %559 = vst.msk [vmem:[#allocation2 + $0x48] sm:$0xff] %vm558_vm2, %v556_v46  ;;  %624 = vmatprep.subr.bf16.mxu0 %v1175_v0 }
  0xf3   : > { %v568_v48 = vpop.permute.xlu0 %567  ;;  %v580_v49 = vpop.permute.xlu1 %579 }
  0xf4   : > { %625 = vmatpush1.bf16.msra.mxu0 %v593_v47  ;;  %571 = vst.msk [vmem:[#allocation2 + $0x50] sm:$0xff] %vm570_vm3, %v568_v48  ;;  %v594_v50 = vld [vmem:[#allocation2 + $0x40] sm:$0xff] }
  0xf5   : > { %583 = vst.msk [vmem:[#allocation2 + $0x50] sm:$0xff] %vm582_vm4, %v580_v49  ;;  %626 = vmatprep.subr.bf16.mxu0 %v1175_v0 }
  0xf8   : > { %627 = vmatpush1.bf16.msra.mxu0 %v594_v50  ;;  %v595_v51 = vld [vmem:[#allocation2 + $0x48] sm:$0xff] }
  0xf9   : > { %628 = vmatprep.subr.bf16.mxu0 %v1175_v0 }
  0xfc   : > { %629 = vmatpush1.bf16.msra.mxu0 %v595_v51  ;;  %v596_v52 = vld [vmem:[#allocation2 + $0x50] sm:$0xff] }
  0xfd   : > { %630 = vmatprep.subr.bf16.mxu0 %v1175_v0 }
 0x100   : > { %631 = vmatpush1.bf16.msra.mxu0 %v596_v52 }
 0x103   : > { %643 = vmatmul.mubr.bf16.vlgmr.msra.gmra.mrb[0].mxu0 %v1010_v53 }
 0x104   : > { %v677_v19 = vpop.permute.xlu0 %676 }
 0x1d6   : > { %v644_v56 = vpop.f32.mrb[0].mxu0 }
 0x1d7   : > { %v651_v57 = vmin.f32 %v644_v56, 20.0  ;;  %v646_v58 = vpop.f32.mrb[1].mxu0 }
 0x1d8   : > { %v647_v59 = vpop.f32.mrb[2].mxu0 }
 0x1d9   : > { %v653_v60 = vmul.f32 1.442695, %v651_v57  ;;  %v652_v61 = vmin.f32 %v647_v59, 20.0  ;;  %v649_v62 = vpop.f32.mrb[3].mxu0 }
 0x1db   : > { %1013 = vpow2.f32 %v653_v60  ;;  %v655_v63 = vmul.f32 1.442695, %v652_v61 }
 0x1dd   : > { %1015 = vpow2.f32 %v655_v63 }
 0x1e5   : > { %v1014_v0 = vpop.eup %1013 }
 0x1e6   : > { %v657_v1 = vadd.f32 1.0, %v1014_v0 }
 0x1e7   : > { %v1016_v2 = vpop.eup %1015 }
 0x1e8   : > { %v659_v3 = vmul.f32 %v657_v1, %v657_v1  ;;  %v658_v4 = vadd.f32 1.0, %v1016_v2 }
 0x1ea   : > { %v663_v5 = vadd.f32 1.0, %v659_v3  ;;  %v660_v6 = vmul.f32 %v658_v4, %v658_v4  ;;  %v888_v8 = vadd.f32 -1.0, %v659_v3 }
 0x1ec   : > { %1017 = vrcp.f32 %v663_v5  ;;  %v664_v7 = vadd.f32 1.0, %v660_v6  ;;  %v889_v11 = vadd.f32 -1.0, %v660_v6 }
 0x1ee   : > { %1019 = vrcp.f32 %v664_v7 }
 0x1f6   : > { %v1018_v9 = vpop.eup %1017 }
 0x1f7   : > { %v666_v10 = vmul.f32 %v1018_v9, %v888_v8 }
 0x1f8   : > { %v1020_v12 = vpop.eup %1019 }
 0x1f9   : > { %v668_v13 = vmul.f32 %v1020_v12, %v889_v11  ;;  %v669_v14 = vmul.f32 %v666_v10, %v644_v56 }
 0x1fb   : > { %v670_v15 = vmul.f32 %v668_v13, %v647_v59 }
 0x1fd   : > { %v672_v16 = vpack.c.bf16 %v670_v15, %v669_v14 }
 0x1ff   : > { %v685_v17 = vsel %vm683_vm6, %v672_v16, 0 }
 0x200   : > { %900 = vmatpush3.bf16.msra.mxu1 %v685_v17 }
 0x203   : > { %902 = vmatmul.mubr.msk.bf16.vlgmr.msra.gmra.mrb[0].mxu1 %vm679_vm7, %v671_v18 }
 0x2d6   : > { %v721_v20 = vpop.f32.mrb[0].mxu1 }
 0x2d7   : > { %v722_v21 = vadd.f32 %v721_v20, %v677_v19  ;;  %v903_v22 = vpop.f32.mrb[1].mxu1 }
 0x2d8   : > { %v724_v23 = vpop.f32.mrb[2].mxu1 }
 0x2d9   : > { %727 = vst [vmem:[%s332_s16] sm:$0xff] %v722_v21  ;;  %v904_v24 = vpop.f32.mrb[3].mxu1 }
 0x2da   : > { %1095 = shalt.err (!%p1092_p11)
}
 0x2db   : > { %s1096_s26 = scalar_lea.hbm %s1460_s0, 128  ;;  %s1100_s14 = scalar_lea.hbm %s1515_s6, 256 }
 0x2dc   : > { %p1097_p5 = scmp.ne.s32.totalorder %s1460_s0, %s1096_s26  ;;  %p1101_p3 = scmp.lt.u32.totalorder %s1460_s0, %s1515_s6 }
 0x2dd   : > { %p1102_p4 = scmp.lt.u32.totalorder %s1100_s14, %s1096_s26  ;;  %p1104_p0 = scmp.lt.u32.totalorder %s1096_s26, %s1460_s0 }
 0x2de   : > { %p1098_p10 = pnand %p1097_p5, %p1534_p2 }
 0x2df   : > { %p1103_p8 = por %p1102_p4, %p1101_p3 }
 0x2e0   : > { %p1099_p1 = pneg %p1098_p10 }
 0x2e1   : > { %p1105_p12 = por %p1104_p0, %p1103_p8 }
 0x2e3   : > { %p1106_p13 = pnand %p1105_p12, %p1099_p1 }
 0x2e5   : > { %1109 = shalt.err (!%p1106_p13)
}
 0x2e6   : > { %909 = dma.vmem_to_hbm [thread:$0]  (%p1534_p2), %s1462_s18, 128, %s1460_s0, %s729_s28  }
 0x2e7 PF: > { %s755_s13 = sand.u32 1, %s1148_s21   ;;  %p1535_p6 = scmp.ne.s32.totalorder %s1527_s11, 0 }
 0x2e8   : > { %p1536_p7 = scmp.ge.s32.totalorder %s1168_s25, 2  ;;  %s756_s8 = scalar_lea.sflag [#allocation5], %s755_s13 }
 0x2ea   : > { %p919_p9 = pnand %p1536_p7, %p1535_p6 }
 0x2ec   : > { %1143 = dma.done.wait (!%p919_p9), %s756_s8, 128  }
 0x2ed   : > { %1145 = vsyncadd (!%p919_p9), %s756_s8, 4294967168  ;;  %s25_s25 = sadd.s32 1, %s1168_s25   ;;  %s1537_s9 = sld [smem:[#allocation13_spill]] }
 0x2ee   : > { %p22_p11 = scmp.ge.s32.totalorder %s25_s25, 4   ;;  %s1538_s15 = sld [smem:[#allocation12_spill]] }
 0x2ef   : > { %s1539_s21 = smov %s1152_s22  ;;  %s1540_s22 = smov %s1156_s3 }
 0x2f0   : > { %s1542_s23 = smov %s1164_s24  ;;  %24 = sbr.rel (!%p22_p11) target bundleno = 10 (0xa), region = 102 }
 0x2f3   : > { %s1541_s3 = smov %s1537_s9 }
 0x2f4   : > { %s1543_s24 = smov %s1538_s15 }
 0x2f7   :  { %761 = vsyncpa [#allocation4], 1 }
 0x2f8   :  { %763 = vsyncpa [#allocation4 + $0x1], 1 }
 0x2f9   :  { %764 = vsyncpa [#allocation7], 1 }
 0x2fa   :  { %766 = vsyncpa [#allocation7 + $0x1], 1 }
 0x2fb   :  { %767 = vsyncpa [#allocation5], 1 }
 0x2fc   :  { %769 = vsyncpa [#allocation5 + $0x1], 1 }

</bundles_post_ra>
